<compile_context>
chip_gen: v7x
topology: tpu7x:2x2x1
jax: 0.10.0
libtpu: 0.0.40
codegen_flags: <defaults>
</compile_context>

<pallas_src>
import functools

import jax
import jax.numpy as jnp
import numpy as np
from jax.experimental import pallas as pl
from jax.experimental.pallas import tpu as pltpu

ALPHA = 1.0
BETA = 0.5
LAMBDA_VAL = 0.2
EPS = 1e-8
_EPS2 = EPS * EPS          # eps folded inside the squared magnitude (see header)

_LANE = 128                # TPU lane width


def _round_up(x, m):
    return ((x + m - 1) // m) * m


def _vmem_capacity_bytes():
    try:
        return int(pltpu.get_tpu_info().vmem_capacity_bytes)
    except Exception:
        return 64 << 20    # conservative fallback: v7x per-TensorCore capacity


def _hybrid_loss_kernel(xs_ref, basis_ref, w_ref, out_ref, acc0_ref, acc1_ref,
                        *, batch, tk):
    j = pl.program_id(1)
    last = pl.num_programs(1) - 1

    @pl.when(j == 0)
    def _init():
        acc0_ref[...] = jnp.zeros_like(acc0_ref)
        acc1_ref[...] = jnp.zeros_like(acc1_ref)
        # Time-domain SSE computed up front so it overlaps the prefetch of the
        # next basis tile instead of sitting in the epilogue.
        xs0 = xs_ref[...]
        d = xs0[0:batch, :] - xs0[batch:2 * batch, :]
        out_ref[0, 2] = jnp.sum(d * d)

    # One fused MXU pass for BOTH signals and BOTH basis components:
    # (2B, N) x (N, 2*tk) -> [ Re | Im ].
    prod = jnp.dot(xs_ref[...], basis_ref[...],
                   preferred_element_type=jnp.float32)
    re = prod[:, :tk]
    im = prod[:, tk:]
    mag2 = re * re + im * im                               # (2B, tk)

    # log(|X| + eps) ~= 0.5 * log(|X|^2 + eps^2): no sqrt, single log per bin.
    logm = 0.5 * jnp.log(mag2 + _EPS2)
    di = logm[0:batch, :] - logm[batch:2 * batch, :]       # (B, tk)

    w = w_ref[...]                                         # (1, tk); 0 on padding,
    # Pure-VPU elementwise accumulation; the cross-lane/sublane reduce is
    # deferred to the final grid step (keeps XLU off the streamed path).
    acc0_ref[...] += di * di * w                           # 1 at k=0,N/2, 2 inside
    acc1_ref[...] += di * w

    @pl.when(j == last)
    def _finalize():
        out_ref[0, 0] = jnp.sum(acc0_ref[...])             # sum w * di^2
        out_ref[0, 1] = jnp.sum(acc1_ref[...])             # sum w * di


@functools.lru_cache(maxsize=8)
def _dft_fused_basis(n, kp, tk):
    """Half-spectrum DFT basis interleaved per tile as [cos_tile | sin_tile]
    (shape (n, 2*kp)) plus Hermitian-symmetry weights (1, kp), both f32.
    Padded frequency columns are zero (and carry zero weight).  Cached."""
    k_half = n // 2 + 1
    idx_n = np.arange(n, dtype=np.float64)[:, None]
    idx_k = np.arange(k_half, dtype=np.float64)[None, :]
    ang = 2.0 * np.pi * idx_n * idx_k / n
    cos_full = np.zeros((n, kp), np.float32)
    sin_full = np.zeros((n, kp), np.float32)
    cos_full[:, :k_half] = np.cos(ang)
    sin_full[:, :k_half] = np.sin(ang)
    fused = np.empty((n, 2 * kp), np.float32)
    for j in range(kp // tk):
        lo = j * tk
        fused[:, 2 * lo:2 * lo + tk] = cos_full[:, lo:lo + tk]
        fused[:, 2 * lo + tk:2 * lo + 2 * tk] = sin_full[:, lo:lo + tk]
    w = np.zeros((1, kp), np.float32)
    w[0, :k_half] = 2.0
    w[0, 0] = 1.0
    if n % 2 == 0:
        w[0, n // 2] = 1.0
    return jnp.asarray(fused), jnp.asarray(w)


def hybrid_loss(predicted, target):
    """predicted, target: (B, N) arrays. Returns scalar float32 loss."""
    assert predicted.shape == target.shape and predicted.ndim == 2
    B, N = predicted.shape
    numel = float(B * N)

    vmem_cap = _vmem_capacity_bytes()

    # --- frequency tiling derived from actual VMEM capacity ------------------
    k_half = N // 2 + 1
    kp = _round_up(k_half, _LANE)
    # Double-buffered fused basis tile (N, 2*tk) f32 must fit in ~40% of VMEM.
    budget = int(0.4 * vmem_cap)
    tk_cap = max(_LANE, (budget // (16 * N)) // _LANE * _LANE)
    tk = min(512, tk_cap, kp)
    kp = _round_up(kp, tk)
    num_tiles = kp // tk

    # Two-way frequency split: on dual-TensorCore parts the "parallel" axis
    # shards the halves across cores; on single-TC parts it is a plain loop.
    n_split = 2 if num_tiles >= 2 else 1
    kp = _round_up(kp, tk * n_split)
    num_tiles = kp // tk
    tiles_per_split = num_tiles // n_split

    fused_basis, w = _dft_fused_basis(N, kp, tk)

    # Single (2B, N) stacked input: removes duplicate pred/target residency and
    # the in-kernel stacking copy.
    xs = jnp.concatenate(
        [predicted.astype(jnp.float32), target.astype(jnp.float32)], axis=0)
    b_rows = 2 * B

    # --- explicit VMEM budget -------------------------------------------------
    vmem_est = (2 * (N * 2 * tk * 4)           # fused basis tile, double-buffered
                + 2 * (b_rows * N * 4)         # stacked signals
                + 2 * (max(B, 8) * tk * 4)     # vector accumulators
                + 8 * (b_rows * 2 * tk * 4)    # in-flight intermediates
                + (4 << 20))                   # headroom
    vmem_limit = int(min(max(32 << 20, vmem_est + (8 << 20)),
                         int(0.92 * vmem_cap)))

    kernel = functools.partial(_hybrid_loss_kernel, batch=B, tk=tk)

    grid_spec = pltpu.PrefetchScalarGridSpec(
        num_scalar_prefetch=0,
        grid=(n_split, tiles_per_split),
        in_specs=[
            # Stacked [pred; target]: VMEM-resident, grid-invariant block.
            # TODO(synk): pipeline_mode=pl.Buffered(1) would single-buffer this
            # constant block; left at default buffering for portability.
            pl.BlockSpec((b_rows, N), lambda c, j: (0, 0)),
            # Fused [cos|sin] basis tile, streamed along the frequency axis.
            pl.BlockSpec((N, 2 * tk), lambda c, j: (0, c * tiles_per_split + j)),
            # Hermitian-symmetry weights for this tile (0 on padded bins).
            pl.BlockSpec((1, tk), lambda c, j: (0, c * tiles_per_split + j)),
        ],
        out_specs=pl.BlockSpec((1, 3), lambda c, j: (c, 0),
                               memory_space=pltpu.MemorySpace.SMEM),
        scratch_shapes=[
            pltpu.VMEM((B, tk), jnp.float32),   # running sum_j w * di^2 (vector)
            pltpu.VMEM((B, tk), jnp.float32),   # running sum_j w * di   (vector)
        ],
    )

    partials = pl.pallas_call(
        kernel,
        out_shape=jax.ShapeDtypeStruct((n_split, 3), jnp.float32),
        grid_spec=grid_spec,
        compiler_params=pltpu.CompilerParams(
            dimension_semantics=("parallel", "arbitrary"),
            vmem_limit_bytes=vmem_limit,
        ),
    )(xs, fused_basis, w)

    # Tiny scalar epilogue in plain XLA: combine the per-split partial sums.
    sum_wdi2 = jnp.sum(partials[:, 0])
    sum_wdi = jnp.sum(partials[:, 1])
    ss_time = partials[0, 2]
    time_loss = ss_time / numel
    freq_loss = (sum_wdi2 / numel
                 - (LAMBDA_VAL / (numel * numel)) * (sum_wdi * sum_wdi))
    return ALPHA * time_loss + BETA * freq_loss


def hybrid_loss_ref(predicted, target):
    """Plain-JAX reference mirroring the PyTorch module."""
    time_loss = jnp.mean((predicted - target) ** 2)
    pred_psd = jnp.abs(jnp.fft.fft(predicted, axis=-1)) + EPS
    targ_psd = jnp.abs(jnp.fft.fft(target, axis=-1)) + EPS
    di = jnp.log(pred_psd) - jnp.log(targ_psd)
    numel = di.size
    freq_loss = jnp.mean(di ** 2) - (LAMBDA_VAL / (numel * numel)) * (jnp.sum(di) ** 2)
    return ALPHA * time_loss + BETA * freq_loss


if __name__ == "__main__":
    key = jax.random.PRNGKey(0)
    k1, k2 = jax.random.split(key)
    B, N = 4, 128  # batch of rPPG signals, N samples each
    predicted = jax.random.normal(k1, (B, N), dtype=jnp.float32)
    target = jax.random.normal(k2, (B, N), dtype=jnp.float32)

    loss = hybrid_loss(predicted, target)
    jax.block_until_ready(loss)

    ref = hybrid_loss_ref(predicted, target)
    np.testing.assert_allclose(np.asarray(loss), np.asarray(ref), rtol=2e-3, atol=1e-4)

    print("KERNEL_OK")
</pallas_src>

<mosaic_0001>
module attributes {stable_mosaic.version = 11 : i64} {
  func.func @_hybrid_loss_kernel(%arg0: i32, %arg1: i32, %arg2: memref<8x128xf32, #tpu.memory_space<vmem>>, %arg3: memref<128x256xf32, #tpu.memory_space<vmem>>, %arg4: memref<1x128xf32, #tpu.memory_space<vmem>>, %arg5: memref<1x3xf32, #tpu.memory_space<smem>>, %arg6: memref<4x128xf32, #tpu.memory_space<vmem>>, %arg7: memref<4x128xf32, #tpu.memory_space<vmem>>) attributes {dimension_semantics = [#tpu.dimension_semantics<parallel>, #tpu.dimension_semantics<arbitrary>], iteration_bounds = array<i64: 1, 1>, scalar_prefetch = 0 : i64, scratch_operands = 2 : i64, tpu.core_type = #tpu.core_type<tc>, window_params = [{pipeline_mode = #tpu.pipeline_mode<synchronous>, transform_indices = @transform_0, window_bounds = array<i64: 8, 128>}, {transform_indices = @transform_1, window_bounds = array<i64: 128, 256>}, {transform_indices = @transform_2, window_bounds = array<i64: 1, 128>}, {transform_indices = @transform_3, window_bounds = array<i64: 1, 3>}]} {
    %c0_i32 = arith.constant 0 : i32
    %0 = arith.cmpi eq, %arg1, %c0_i32 : i32
    %1 = arith.extui %0 : i1 to i32
    %c0_i32_0 = arith.constant 0 : i32
    %2 = arith.cmpi ne, %1, %c0_i32_0 : i32
    scf.if %2 {
      %cst_18 = arith.constant 0.000000e+00 : f32
      %34 = vector.broadcast %cst_18 : f32 to vector<4x128xf32>
      %c0_19 = arith.constant 0 : index
      %c0_20 = arith.constant 0 : index
      %35 = vector.load %arg6[%c0_19, %c0_20] : memref<4x128xf32, #tpu.memory_space<vmem>>, vector<4x128xf32>
      tpu.vector_store %arg6[%c0_19, %c0_20], %34 {strides = array<i32>} : memref<4x128xf32, #tpu.memory_space<vmem>>, vector<4x128xf32>,
      %cst_21 = arith.constant 0.000000e+00 : f32
      %36 = vector.broadcast %cst_21 : f32 to vector<4x128xf32>
      %c0_22 = arith.constant 0 : index
      %c0_23 = arith.constant 0 : index
      %37 = vector.load %arg7[%c0_22, %c0_23] : memref<4x128xf32, #tpu.memory_space<vmem>>, vector<4x128xf32>
      tpu.vector_store %arg7[%c0_22, %c0_23], %36 {strides = array<i32>} : memref<4x128xf32, #tpu.memory_space<vmem>>, vector<4x128xf32>,
      %c0_24 = arith.constant 0 : index
      %c0_25 = arith.constant 0 : index
      %38 = vector.load %arg2[%c0_24, %c0_25] : memref<8x128xf32, #tpu.memory_space<vmem>>, vector<8x128xf32>
      %39 = vector.extract_strided_slice %38 {offsets = [0, 0], sizes = [4, 128], strides = [1, 1]} : vector<8x128xf32> to vector<4x128xf32>
      %40 = vector.extract_strided_slice %38 {offsets = [4, 0], sizes = [4, 128], strides = [1, 1]} : vector<8x128xf32> to vector<4x128xf32>
      %41 = arith.subf %39, %40 : vector<4x128xf32>
      %42 = arith.mulf %41, %41 : vector<4x128xf32>
      %43 = vector.shape_cast %42 : vector<4x128xf32> to vector<1x4x128xf32>
      %cst_26 = arith.constant dense<0.000000e+00> : vector<1xf32>
      %44 = vector.multi_reduction <add>, %43, %cst_26 [1, 2] : vector<1x4x128xf32> to vector<1xf32>
      %45 = vector.shape_cast %44 : vector<1xf32> to vector<1x1x1xf32>
      %46 = vector.extract %45[0, 0, 0] : f32 from vector<1x1x1xf32>
      %c0_27 = arith.constant 0 : index
      %c2 = arith.constant 2 : index
      %47 = memref.load %arg5[%c0_27, %c2] : memref<1x3xf32, #tpu.memory_space<smem>>
      memref.store %46, %arg5[%c0_27, %c2] : memref<1x3xf32, #tpu.memory_space<smem>>
    } else {
    }
    %c0 = arith.constant 0 : index
    %c0_1 = arith.constant 0 : index
    %3 = vector.load %arg2[%c0, %c0_1] : memref<8x128xf32, #tpu.memory_space<vmem>>, vector<8x128xf32>
    %c0_2 = arith.constant 0 : index
    %c0_3 = arith.constant 0 : index
    %4 = vector.load %arg3[%c0_2, %c0_3] : memref<128x256xf32, #tpu.memory_space<vmem>>, vector<128x256xf32>
    %cst = arith.constant dense<0.000000e+00> : vector<8x256xf32>
    %5 = tpu.matmul %3, %4, %cst {dimension_numbers = #tpu.dot_dimension_numbers<[1], [0], [0], [1], [0, 0, 1, 1], [], []>} : vector<8x128xf32>, vector<128x256xf32>, vector<8x256xf32> -> vector<8x256xf32>
    %6 = vector.extract_strided_slice %5 {offsets = [0, 0], sizes = [8, 128], strides = [1, 1]} : vector<8x256xf32> to vector<8x128xf32>
    %7 = vector.extract_strided_slice %5 {offsets = [0, 128], sizes = [8, 128], strides = [1, 1]} : vector<8x256xf32> to vector<8x128xf32>
    %8 = arith.mulf %6, %6 : vector<8x128xf32>
    %9 = arith.mulf %7, %7 : vector<8x128xf32>
    %10 = arith.addf %8, %9 : vector<8x128xf32>
    %cst_4 = arith.constant 1.000000e-16 : f32
    %11 = vector.broadcast %cst_4 : f32 to vector<8x128xf32>
    %12 = arith.addf %10, %11 : vector<8x128xf32>
    %13 = math.log %12 : vector<8x128xf32>
    %cst_5 = arith.constant 5.000000e-01 : f32
    %14 = vector.broadcast %cst_5 : f32 to vector<8x128xf32>
    %15 = arith.mulf %14, %13 : vector<8x128xf32>
    %16 = vector.extract_strided_slice %15 {offsets = [0, 0], sizes = [4, 128], strides = [1, 1]} : vector<8x128xf32> to vector<4x128xf32>
    %17 = vector.extract_strided_slice %15 {offsets = [4, 0], sizes = [4, 128], strides = [1, 1]} : vector<8x128xf32> to vector<4x128xf32>
    %18 = arith.subf %16, %17 : vector<4x128xf32>
    %c0_6 = arith.constant 0 : index
    %c0_7 = arith.constant 0 : index
    %19 = vector.load %arg4[%c0_6, %c0_7] : memref<1x128xf32, #tpu.memory_space<vmem>>, vector<1x128xf32>
    %c0_8 = arith.constant 0 : index
    %c0_9 = arith.constant 0 : index
    %20 = vector.load %arg6[%c0_8, %c0_9] : memref<4x128xf32, #tpu.memory_space<vmem>>, vector<4x128xf32>
    %21 = arith.mulf %18, %18 : vector<4x128xf32>
    %22 = vector.broadcast %19 : vector<1x128xf32> to vector<4x128xf32>
    %23 = arith.mulf %21, %22 : vector<4x128xf32>
    %24 = arith.addf %20, %23 : vector<4x128xf32>
    %c0_10 = arith.constant 0 : index
    %c0_11 = arith.constant 0 : index
    %25 = vector.load %arg6[%c0_10, %c0_11] : memref<4x128xf32, #tpu.memory_space<vmem>>, vector<4x128xf32>
    tpu.vector_store %arg6[%c0_10, %c0_11], %24 {strides = array<i32>} : memref<4x128xf32, #tpu.memory_space<vmem>>, vector<4x128xf32>,
    %c0_12 = arith.constant 0 : index
    %c0_13 = arith.constant 0 : index
    %26 = vector.load %arg7[%c0_12, %c0_13] : memref<4x128xf32, #tpu.memory_space<vmem>>, vector<4x128xf32>
    %27 = vector.broadcast %19 : vector<1x128xf32> to vector<4x128xf32>
    %28 = arith.mulf %18, %27 : vector<4x128xf32>
    %29 = arith.addf %26, %28 : vector<4x128xf32>
    %c0_14 = arith.constant 0 : index
    %c0_15 = arith.constant 0 : index
    %30 = vector.load %arg7[%c0_14, %c0_15] : memref<4x128xf32, #tpu.memory_space<vmem>>, vector<4x128xf32>
    tpu.vector_store %arg7[%c0_14, %c0_15], %29 {strides = array<i32>} : memref<4x128xf32, #tpu.memory_space<vmem>>, vector<4x128xf32>,
    %c0_i32_16 = arith.constant 0 : i32
    %31 = arith.cmpi eq, %arg1, %c0_i32_16 : i32
    %32 = arith.extui %31 : i1 to i32
    %c0_i32_17 = arith.constant 0 : i32
    %33 = arith.cmpi ne, %32, %c0_i32_17 : i32
    scf.if %33 {
      %c0_18 = arith.constant 0 : index
      %c0_19 = arith.constant 0 : index
      %34 = vector.load %arg6[%c0_18, %c0_19] : memref<4x128xf32, #tpu.memory_space<vmem>>, vector<4x128xf32>
      %35 = vector.shape_cast %34 : vector<4x128xf32> to vector<1x4x128xf32>
      %cst_20 = arith.constant dense<0.000000e+00> : vector<1xf32>
      %36 = vector.multi_reduction <add>, %35, %cst_20 [1, 2] : vector<1x4x128xf32> to vector<1xf32>
      %37 = vector.shape_cast %36 : vector<1xf32> to vector<1x1x1xf32>
      %38 = vector.extract %37[0, 0, 0] : f32 from vector<1x1x1xf32>
      %c0_21 = arith.constant 0 : index
      %c0_22 = arith.constant 0 : index
      %39 = memref.load %arg5[%c0_21, %c0_22] : memref<1x3xf32, #tpu.memory_space<smem>>
      memref.store %38, %arg5[%c0_21, %c0_22] : memref<1x3xf32, #tpu.memory_space<smem>>
      %c0_23 = arith.constant 0 : index
      %c0_24 = arith.constant 0 : index
      %40 = vector.load %arg7[%c0_23, %c0_24] : memref<4x128xf32, #tpu.memory_space<vmem>>, vector<4x128xf32>
      %41 = vector.shape_cast %40 : vector<4x128xf32> to vector<1x4x128xf32>
      %cst_25 = arith.constant dense<0.000000e+00> : vector<1xf32>
      %42 = vector.multi_reduction <add>, %41, %cst_25 [1, 2] : vector<1x4x128xf32> to vector<1xf32>
      %43 = vector.shape_cast %42 : vector<1xf32> to vector<1x1x1xf32>
      %44 = vector.extract %43[0, 0, 0] : f32 from vector<1x1x1xf32>
      %c0_26 = arith.constant 0 : index
      %c1 = arith.constant 1 : index
      %45 = memref.load %arg5[%c0_26, %c1] : memref<1x3xf32, #tpu.memory_space<smem>>
      memref.store %44, %arg5[%c0_26, %c1] : memref<1x3xf32, #tpu.memory_space<smem>>
    } else {
    }
    return
  }
  func.func @transform_0(%arg0: i32, %arg1: i32) -> (i32, i32) {
    %c0_i32 = arith.constant 0 : i32
    %c0_i32_0 = arith.constant 0 : i32
    %c0_i32_1 = arith.constant 0 : i32
    return %c0_i32, %c0_i32_0 : i32, i32
  }
  func.func @transform_1(%arg0: i32, %arg1: i32) -> (i32, i32) {
    %c1_i32 = arith.constant 1 : i32
    %0 = arith.muli %arg0, %c1_i32 : i32
    %1 = arith.addi %0, %arg1 : i32
    %c0_i32 = arith.constant 0 : i32
    %c0_i32_0 = arith.constant 0 : i32
    return %c0_i32, %1 : i32, i32
  }
  func.func @transform_2(%arg0: i32, %arg1: i32) -> (i32, i32) {
    %c1_i32 = arith.constant 1 : i32
    %0 = arith.muli %arg0, %c1_i32 : i32
    %1 = arith.addi %0, %arg1 : i32
    %c0_i32 = arith.constant 0 : i32
    %c0_i32_0 = arith.constant 0 : i32
    return %c0_i32, %1 : i32, i32
  }
  func.func @transform_3(%arg0: i32, %arg1: i32) -> (i32, i32) {
    %c0_i32 = arith.constant 0 : i32
    %c0_i32_0 = arith.constant 0 : i32
    return %arg0, %c0_i32 : i32, i32
  }
}

</mosaic_0001>

<bundles_post_ra>
// kernel: tpu_custom_call.1
= control target key start
LH: loop header
LB: loop body
LE: loop exit
PB: predicated region body
PF: predicated region fallthrough
CT: control target
= control target key end

     0   :  { %8 = vsyncpa [#allocation5], 0  ;;  %s447_s0 = inlined_call_operand.hbm [shape: f32[8,128], index: 0, kind: input, shape index: {}]   ;;  %s448_s1 = inlined_call_operand.hbm [shape: f32[128,256], index: 1, kind: input, shape index: {}]   ;;  %s449_s2 = inlined_call_operand.vmem [shape: f32[1,128], index: 2, kind: input, shape index: {}]   ;;  %s450_s3 = inlined_call_operand.hbm [shape: f32[1,3], index: 3, kind: output, shape index: {}]  }
   0x1   :  { %9 = vsyncpa [#allocation8], 0 }
   0x2   :  { %10 = vsyncpa [#allocation6], 0  ;;  %s372_s12 = smov [#allocation4]   ;;  %s373_s14 = smov [#allocation7]  }
   0x3   :  { %s17_s13 = sshll.u32 %s372_s12, 4  ;;  %s30_s15 = sshll.u32 %s373_s14, 4  ;;  %s18_s13 = int_to_ptr.vmem [resolvable:$true] %s17_s13  ;;  %s398_s15 = int_to_ptr.vmem [resolvable:$true] %s30_s15 }
   0x4   :  { %s312_s18 = scalar_lea.hbm %s447_s0, 128 }
   0x5   :  { %p313_p0 = scmp.ne.s32.totalorder %s447_s0, %s312_s18  ;;  %p316_p1 = scmp.lt.u32.totalorder %s312_s18, %s447_s0 }
   0x7   :  { %p318_p2 = pnand %p316_p1, %p313_p0 }
   0x9   :  { %321 = shalt.err (!%p318_p2)
}
   0xa   :  { %s322_s23 = scalar_lea.vmem %s18_s13, 128  ;;  %p327_p4 = scmp.lt.s32.totalorder %s18_s13, %s18_s13 }
   0xb   :  { %p323_p3 = scmp.ne.s32.totalorder %s18_s13, %s322_s23  ;;  %p328_p5 = scmp.lt.s32.totalorder %s322_s23, %s322_s23 }
   0xd   :  { %p329_p6 = por %p328_p5, %p327_p4 }
   0xf   :  { %p330_p7 = pnand %p329_p6, %p323_p3 }
  0x11   :  { %333 = shalt.err (!%p330_p7)
}
  0x12   :  { %20 = dma.hbm_to_vmem [thread:$0]  %s447_s0, 128, %s18_s13, [#allocation5]  }
  0x13   :  { %s334_s28 = scalar_lea.hbm %s448_s1, 4096 }
  0x14   :  { %p335_p8 = scmp.ne.s32.totalorder %s448_s1, %s334_s28  ;;  %p338_p9 = scmp.lt.u32.totalorder %s334_s28, %s448_s1 }
  0x16   :  { %p340_p10 = pnand %p338_p9, %p335_p8 }
  0x18   :  { %343 = shalt.err (!%p340_p10)
}
  0x19   :  { %s344_s6 = scalar_lea.vmem %s398_s15, 4096  ;;  %p349_p12 = scmp.lt.s32.totalorder %s398_s15, %s398_s15 }
  0x1a   :  { %p345_p11 = scmp.ne.s32.totalorder %s398_s15, %s344_s6  ;;  %p350_p13 = scmp.lt.s32.totalorder %s344_s6, %s344_s6 }
  0x1c   :  { %p351_p0 = por %p350_p13, %p349_p12 }
  0x1e   :  { %p352_p1 = pnand %p351_p0, %p345_p11 }
  0x20   :  { %355 = shalt.err (!%p352_p1)
}
  0x21   :  { %s374_s0 = smov 256   ;;  %s375_s7 = smov 16  }
  0x22   :  { %36 = dma.hbm_to_vmem [thread:$0]  %s448_s1, 4096, %s398_s15, [#allocation8], %s374_s0, %s374_s0, %s375_s7  }
  0x23   :  { %366 = dma.done.wait [#allocation5], 128  }
  0x24   :  { %367 = vsyncadd [#allocation5], 4294967168 }
  0x25   :  { %368 = dma.done.wait [#allocation8], 4096  }
  0x26   :  { %369 = vsyncadd [#allocation8], 4294963200  ;;  %v376_v0 = vmov 0.0   ;;  %v88_v1 = vld [vmem:[#allocation7 + $0x8] sm:$0xff]  ;;  %v90_v2 = vld [vmem:[#allocation7 + $0x18] sm:$0xff]  ;;  %vm73_vm0 = vcmask 1043456  }
  0x27   :  { %65 = vst [vmem:[#allocation2] sm:$0xf] %v376_v0  ;;  %66 = vst [vmem:[#allocation3] sm:$0xf] %v376_v0  ;;  %183 = vmatprep.mubr.f32.mxu0 %v376_v0  ;;  %v87_v3 = vld [vmem:[#allocation7] sm:$0xff]  ;;  %v266_v4 = vpack.c.bf16 %v90_v2, %v88_v1  ;;  %v89_v5 = vld [vmem:[#allocation7 + $0x10] sm:$0xff] }
  0x28   :  { %v92_v6 = vld [vmem:[#allocation7 + $0x28] sm:$0xff]  ;;  %v94_v7 = vld [vmem:[#allocation7 + $0x38] sm:$0xff]  ;;  %v268_v8 = vpack.c.bf16 %v89_v5, %v87_v3  ;;  %v91_v10 = vld [vmem:[#allocation7 + $0x20] sm:$0xff]  ;;  %s356_s15 = scalar_lea.hbm %s450_s3, 16 }
  0x29   :  { %v270_v9 = vpack.c.bf16 %v94_v7, %v92_v6  ;;  %v93_v11 = vld [vmem:[#allocation7 + $0x30] sm:$0xff]  ;;  %v96_v12 = vld [vmem:[#allocation7 + $0x48] sm:$0xff]  ;;  %267 = vmatprep.subr.bf16.mxu0 %v266_v4  ;;  %v98_v13 = vld [vmem:[#allocation7 + $0x58] sm:$0xff]  ;;  %p357_p2 = scmp.ne.s32.totalorder %s450_s3, %s356_s15  ;;  %p360_p3 = scmp.lt.u32.totalorder %s356_s15, %s450_s3 }
  0x2a   :  { %269 = vmatpush1.bf16.msra.mxu0 %v268_v8  ;;  %v272_v14 = vpack.c.bf16 %v93_v11, %v91_v10  ;;  %v274_v15 = vpack.c.bf16 %v98_v13, %v96_v12  ;;  %v95_v16 = vld [vmem:[#allocation7 + $0x40] sm:$0xff]  ;;  %v97_v17 = vld [vmem:[#allocation7 + $0x50] sm:$0xff]  ;;  %v100_v18 = vld [vmem:[#allocation7 + $0x68] sm:$0xff] }
  0x2b   :  { %271 = vmatprep.subr.bf16.mxu0 %v270_v9  ;;  %v102_v19 = vld [vmem:[#allocation7 + $0x78] sm:$0xff]  ;;  %v276_v20 = vpack.c.bf16 %v97_v17, %v95_v16  ;;  %v99_v22 = vld [vmem:[#allocation7 + $0x60] sm:$0xff]  ;;  %v101_v23 = vld [vmem:[#allocation7 + $0x70] sm:$0xff]  ;;  %p362_p4 = pnand %p360_p3, %p357_p2 }
  0x2c   :  { %v278_v21 = vpack.c.bf16 %v102_v19, %v100_v18  ;;  %v104_v24 = vld [vmem:[#allocation7 + $0x88] sm:$0xff]  ;;  %v106_v25 = vld [vmem:[#allocation7 + $0x98] sm:$0xff]  ;;  %v280_v26 = vpack.c.bf16 %v101_v23, %v99_v22  ;;  %v103_v28 = vld [vmem:[#allocation7 + $0x80] sm:$0xff] }
  0x2d   :  { %v282_v27 = vpack.c.bf16 %v106_v25, %v104_v24  ;;  %v105_v29 = vld [vmem:[#allocation7 + $0x90] sm:$0xff]  ;;  %v108_v30 = vld [vmem:[#allocation7 + $0xa8] sm:$0xff]  ;;  %v110_v31 = vld [vmem:[#allocation7 + $0xb8] sm:$0xff] }
  0x2e   :  { %273 = vmatpush1.bf16.msra.mxu0 %v272_v14  ;;  %v284_v32 = vpack.c.bf16 %v105_v29, %v103_v28  ;;  %v286_v33 = vpack.c.bf16 %v110_v31, %v108_v30  ;;  %v107_v34 = vld [vmem:[#allocation7 + $0xa0] sm:$0xff]  ;;  %v109_v35 = vld [vmem:[#allocation7 + $0xb0] sm:$0xff]  ;;  %v112_v36 = vld [vmem:[#allocation7 + $0xc8] sm:$0xff] }
  0x2f   :  { %275 = vmatprep.subr.bf16.mxu0 %v274_v15  ;;  %v114_v37 = vld [vmem:[#allocation7 + $0xd8] sm:$0xff]  ;;  %v288_v38 = vpack.c.bf16 %v109_v35, %v107_v34  ;;  %v111_v40 = vld [vmem:[#allocation7 + $0xc0] sm:$0xff]  ;;  %v113_v41 = vld [vmem:[#allocation7 + $0xd0] sm:$0xff] }
  0x30   :  { %v290_v39 = vpack.c.bf16 %v114_v37, %v112_v36  ;;  %v116_v42 = vld [vmem:[#allocation7 + $0xe8] sm:$0xff]  ;;  %v118_v43 = vld [vmem:[#allocation7 + $0xf8] sm:$0xff]  ;;  %v292_v44 = vpack.c.bf16 %v113_v41, %v111_v40  ;;  %v115_v46 = vld [vmem:[#allocation7 + $0xe0] sm:$0xff] }
  0x31   :  { %v294_v45 = vpack.c.bf16 %v118_v43, %v116_v42  ;;  %v117_v47 = vld [vmem:[#allocation7 + $0xf0] sm:$0xff]  ;;  %v86_v49 = vld [vmem:[#allocation4] sm:$0xff] }
  0x32   :  { %277 = vmatpush1.bf16.msra.mxu0 %v276_v20  ;;  %v296_v48 = vpack.c.bf16 %v117_v47, %v115_v46  ;;  %v69_v50 = vrot.slane %v86_v49, 4  ;;  %v265_v0 = vld [vmem:[%s449_s2] ss:$0 sm:$0xff]  ;;  %v213_v2 = vld [vmem:[#allocation3] sm:$0xf] }
  0x33   :  { %279 = vmatprep.subr.bf16.mxu0 %v278_v21  ;;  %v202_v5 = vld [vmem:[#allocation2] sm:$0xf] }
  0x34   :  { %v71_v51 = vsub.f32 %v86_v49, %v69_v50 }
  0x36   :  { %281 = vmatpush1.bf16.msra.mxu0 %v280_v26  ;;  %v72_v52 = vmul.f32 %v71_v51, %v71_v51 }
  0x37   :  { %283 = vmatprep.subr.bf16.mxu0 %v282_v27 }
  0x38   :  { %v74_v53 = vsel %vm73_vm0, %v72_v52, 0.0 }
  0x39   :  { %75 = vadd.xlane.f32.xlu0 %v74_v53 }
  0x3a   :  { %285 = vmatpush1.bf16.msra.mxu0 %v284_v32 }
  0x3b   :  { %287 = vmatprep.subr.bf16.mxu0 %v286_v33 }
  0x3e   :  { %289 = vmatpush1.bf16.msra.mxu0 %v288_v38 }
  0x3f   :  { %291 = vmatprep.subr.bf16.mxu0 %v290_v39 }
  0x42   :  { %293 = vmatpush1.bf16.msra.mxu0 %v292_v44 }
  0x43   :  { %295 = vmatprep.subr.bf16.mxu0 %v294_v45 }
  0x46   :  { %297 = vmatpush1.bf16.msra.mxu0 %v296_v48 }
  0x49   :  { %184 = vmatmul.mubr.f32.vlgmr.msra.gmra.mrb[0].mxu0 %v86_v49 }
  0xc6   :  { %v76_v13 = vpop.xlane.xlu0 %75 }
  0xc7   :  { %v77_v14 = vrot.slane %v76_v13, 4 }
  0xc9   :  { %v78_v15 = vadd.f32 %v77_v14, %v76_v13 }
  0xcb   :  { %v79_v16 = vrot.slane %v78_v15, 2 }
  0xcd   :  { %v80_v17 = vadd.f32 %v79_v16, %v78_v15 }
  0xcf   :  { %v81_v18 = vrot.slane %v80_v17, 1 }
  0xd1   :  { %v82_v19 = vadd.f32 %v81_v18, %v80_v17 }
  0xd3   :  { %298 = vpush %v82_v19 }
 0x104   :  { %s299_s2 = spop %298 }
 0x105   :  { %85 = sst [smem:[#allocation9 + $0x2]] %s299_s2 }
 0x11c   :  { %v185_v54 = vpop.f32.mrb[0].mxu0 }
 0x11d   :  { %v190_v55 = vmul.f32 %v185_v54, %v185_v54  ;;  %v187_v56 = vpop.f32.mrb[1].mxu0 }
 0x11e   :  { %v191_v57 = vmul.f32 %v187_v56, %v187_v56 }
 0x120   :  { %v192_v58 = vadd.f32 %v191_v57, %v190_v55 }
 0x122   :  { %v193_v59 = vadd.f32 1e-16, %v192_v58 }
 0x124   :  { %310 = vlog2.f32 %v193_v59 }
 0x12e   :  { %v311_v60 = vpop.eup %310 }
 0x12f   :  { %v195_v61 = vmul.f32 0.6931472, %v311_v60 }
 0x131   :  { %v196_v62 = vmul.f32 0.5, %v195_v61 }
 0x133   :  { %v198_v63 = vrot.slane %v196_v62, 4 }
 0x135   :  { %v200_v1 = vsub.f32 %v196_v62, %v198_v63 }
 0x137   :  { %v203_v3 = vmul.f32 %v200_v1, %v200_v1  ;;  %v214_v4 = vmul.f32 %v265_v0, %v200_v1 }
 0x139   :  { %v210_v6 = vmul.f32 %v265_v0, %v203_v3  ;;  %v215_v7 = vadd.f32 %v214_v4, %v213_v2 }
 0x13b   :  { %v211_v8 = vadd.f32 %v210_v6, %v202_v5  ;;  %216 = vst [vmem:[#allocation3] sm:$0xf] %v215_v7 }
 0x13d   :  { %212 = vst [vmem:[#allocation2] sm:$0xf] %v211_v8 }
 0x142   :  { %v234_v9 = vld [vmem:[#allocation3] sm:$0xf] }
 0x143   :  { %v235_v10 = vsel %vm73_vm0, %v234_v9, 0.0 }
 0x144   :  { %236 = vadd.xlane.f32.xlu1 %v235_v10  ;;  %v220_v11 = vld [vmem:[#allocation2] sm:$0xf] }
 0x145   :  { %v222_v12 = vsel %vm73_vm0, %v220_v11, 0.0 }
 0x146   :  { %223 = vadd.xlane.f32.xlu0 %v222_v12 }
 0x1d1   :  { %v237_v20 = vpop.xlane.xlu1 %236 }
 0x1d2   :  { %v238_v21 = vrot.slane %v237_v20, 4 }
 0x1d3   :  { %v224_v22 = vpop.xlane.xlu0 %223 }
 0x1d4   :  { %v239_v23 = vadd.f32 %v238_v21, %v237_v20  ;;  %v225_v24 = vrot.slane %v224_v22, 4 }
 0x1d6   :  { %v240_v25 = vrot.slane %v239_v23, 2  ;;  %v226_v26 = vadd.f32 %v225_v24, %v224_v22 }
 0x1d8   :  { %v241_v27 = vadd.f32 %v240_v25, %v239_v23  ;;  %v227_v28 = vrot.slane %v226_v26, 2 }
 0x1da   :  { %v228_v29 = vadd.f32 %v227_v28, %v226_v26  ;;  %v242_v30 = vrot.slane %v241_v27, 1 }
 0x1dc   :  { %v229_v31 = vrot.slane %v228_v29, 1  ;;  %v243_v33 = vadd.f32 %v242_v30, %v241_v27 }
 0x1de   :  { %v230_v32 = vadd.f32 %v229_v31, %v228_v29 }
 0x1e0   :  { %300 = vpush %v230_v32 }
 0x1e1   :  { %302 = vpush %v243_v33 }
 0x211   :  { %s301_s11 = spop %300 }
 0x212   :  { %233 = sst [smem:[#allocation9]] %s301_s11  ;;  %s303_s12 = spop %302 }
 0x213   :  { %246 = sst [smem:[#allocation9 + $0x1]] %s303_s12 }
 0x214   :  { %365 = shalt.err (!%p362_p4)
}
 0x215   :  { %s377_s20 = smov [#allocation9]  }
 0x216   :  { %254 = dma.smem_to_hbm %s377_s20, 16, %s450_s3, [#allocation6]  }
 0x217   :  { %370 = dma.done.wait [#allocation6], 16  }
 0x218   :  { %371 = vsyncadd [#allocation6], 4294967280 }
 0x219   :  { %258 = sfence }
 0x21a   :  { %259 = vsyncpa [#allocation5], 1 }
 0x21b   :  { %260 = vsyncpa [#allocation8], 1 }
 0x21c   :  { %261 = vsyncpa [#allocation6], 1 }

</bundles_post_ra>
